<compile_context>
chip_gen: v7x
topology: tpu7x:2x2x1
jax: 0.10.0
libtpu: 0.0.40
codegen_flags: <defaults>
</compile_context>

<pallas_src>
import math
from functools import partial

import jax
import jax.numpy as jnp
from jax.experimental import pallas as pl
from jax.experimental.pallas import tpu as pltpu


def pascal_kernel_1d(kernel_size: int) -> list:
    """Normalized 1-D binomial row; outer(row, row) == kornia's normalized 2-D kernel."""
    denom = float(2 ** (kernel_size - 1))
    return [math.comb(kernel_size - 1, i) / denom for i in range(kernel_size)]


def pascal_kernel_2d(kernel_size: int) -> jnp.ndarray:
    """Normalized 2-D Pascal kernel (reference path only)."""
    row = jnp.array([math.comb(kernel_size - 1, i) for i in range(kernel_size)],
                    dtype=jnp.float32)
    k2d = row[:, None] * row[None, :]
    return k2d / jnp.sum(k2d)


def _sds(start: int, size: int, stride: int):
    """Static (possibly strided) slice."""
    if stride == 1:
        return pl.ds(start, size)
    return pl.ds(start, size, stride=stride)


def _blurpool_kernel(x_ref, o_ref, *, row_w, k, stride, h_out, w_out, hc):
    """One grid step: a channel tile of `cn` lanes.

    x_ref : (H + 2p, W + 2p, cn)  zero-padded input, channels on the lane axis
    o_ref : (H_out, W_out, cn)    output, channels on the lane axis
    """
    s = stride
    n_chunks = -(-h_out // hc)                       # static

    for t in range(n_chunks):                        # static unroll (small)
        r0 = t * hc
        rows = min(hc, h_out - r0)
        span = (rows - 1) * s + k                    # padded input rows this chunk needs

        # ---- Pass 1: horizontal 1-D Pascal blur (strided sublane reads) ----
        # Up-cast per tap is free for f32 inputs and native-bf16 on v6e/v7x.
        hacc = row_w[0] * x_ref[pl.ds(r0 * s, span), _sds(0, w_out, s), :].astype(jnp.float32)
        for j in range(1, k):
            hacc = hacc + row_w[j] * x_ref[pl.ds(r0 * s, span),
                                           _sds(j, w_out, s), :].astype(jnp.float32)
        # hacc: (span, w_out, cn) f32, kept in registers (span bounded via hc).

        # ---- Pass 2: vertical 1-D Pascal blur (leading-axis row combines) --
        for rl in range(rows):
            v = row_w[0] * hacc[rl * s]
            for j in range(1, k):
                v = v + row_w[j] * hacc[rl * s + j]
            o_ref[r0 + rl] = v.astype(o_ref.dtype)   # lane-dense (w_out, cn) store


def blur_pool2d(x: jnp.ndarray, kernel_size: int, stride: int = 2) -> jnp.ndarray:
    """Equivalent of BlurPool2D(kernel_size, stride).forward(x) for x in NCHW."""
    B, C, H, W = x.shape
    k = int(kernel_size)
    s = int(stride)
    p = (k - 1) // 2                                  # kornia's _compute_zero_padding
    H_out = (H + 2 * p - k) // s + 1
    W_out = (W + 2 * p - k) // s + 1
    N = B * C
    itemsize = jnp.dtype(x.dtype).itemsize
    row_w = pascal_kernel_1d(k)
    Hp, Wp = H + 2 * p, W + 2 * p

    # ---- channels-last, zero-padded slab (layout plumbing done by XLA) ------
    xs = jnp.transpose(x.reshape(N, H, W), (1, 2, 0))         # (H, W, N)
    xs = jnp.pad(xs, ((p, p), (p, p), (0, 0)))                # (Hp, Wp, N)

    # ---- generation-aware channel (lane) tile & VMEM budget -----------------
    try:
        vmem_cap = int(pltpu.get_tpu_info().vmem_capacity_bytes)
    except Exception:
        vmem_cap = 64 << 20                                    # v7x-safe fallback

    LANE = 128
    per_ch = 2 * (Hp * Wp + H_out * W_out) * itemsize          # double-buffered in+out
    if N >= LANE:
        budget = min(vmem_cap // 2, 48 << 20)
        cn = max(LANE, (budget // max(per_ch, 1)) // LANE * LANE)
        while cn > LANE and -(-N // cn) < 4:                   # >=4 steps for v7x megacore
            cn -= LANE
        N_pad = -(-N // cn) * cn
        if N_pad != N:
            xs = jnp.pad(xs, ((0, 0), (0, 0), (0, N_pad - N)))
    else:
        # TODO(synk): for full lane density one could pad small N up to 128,
        # but at N this small the extra HBM traffic outweighs the store win.
        cn = N
        N_pad = N

    # ---- chunk the vertical pass so the live f32 intermediate stays small ---
    inter_budget = 96 * 1024
    per_row = max(W_out * cn * 4, 1)
    span_max = max(k, inter_budget // per_row)
    hc = max(1, min(H_out, (span_max - k) // s + 1))

    kernel = partial(_blurpool_kernel, row_w=row_w, k=k, stride=s,
                     h_out=H_out, w_out=W_out, hc=hc)

    need = 2 * (Hp * Wp + H_out * W_out) * cn * itemsize + (2 << 20)
    vmem_limit = int(min(int(vmem_cap * 0.85), max(32 << 20, 2 * need)))
    vmem_limit = max(vmem_limit, need)

    cost = pl.CostEstimate(
        flops=2 * k * N_pad * W_out * (H + H_out),
        transcendentals=0,
        bytes_accessed=N_pad * (Hp * Wp + H_out * W_out) * itemsize)

    # TODO(synk): very large planes would additionally need a halo'd spatial
    # grid axis (manual DMA) so a single (Hp, Wp, cn) block never approaches
    # v7x's 64 MiB VMEM; not needed at these sizes.
    out = pl.pallas_call(
        kernel,
        out_shape=jax.ShapeDtypeStruct((H_out, W_out, N_pad), x.dtype),
        grid_spec=pltpu.PrefetchScalarGridSpec(
            num_scalar_prefetch=0,
            grid=(N_pad // cn,),
            in_specs=[pl.BlockSpec((Hp, Wp, cn), lambda n: (0, 0, n))],
            out_specs=pl.BlockSpec((H_out, W_out, cn), lambda n: (0, 0, n)),
        ),
        compiler_params=pltpu.CompilerParams(
            dimension_semantics=("parallel",),
            vmem_limit_bytes=vmem_limit),
        cost_estimate=cost,
    )(xs)

    out = out[:, :, :N]                                        # drop lane padding
    return jnp.transpose(out, (2, 0, 1)).reshape(B, C, H_out, W_out)


def _reference_blur_pool2d(x, kernel_size, stride):
    """Pure-JAX reference: depthwise conv exactly like F.conv2d(..., groups=C)."""
    B, C, H, W = x.shape
    k2d = pascal_kernel_2d(kernel_size).astype(x.dtype)
    wgt = jnp.tile(k2d[None, None], (C, 1, 1, 1))              # (C, 1, k, k)
    p = (kernel_size - 1) // 2
    return jax.lax.conv_general_dilated(
        x, wgt,
        window_strides=(stride, stride),
        padding=((p, p), (p, p)),
        dimension_numbers=("NCHW", "OIHW", "NCHW"),
        feature_group_count=C,
        precision=jax.lax.Precision.HIGHEST)


if __name__ == "__main__":
    key = jax.random.PRNGKey(0)
    B, C, H, W = 2, 4, 16, 16
    x = jax.random.normal(key, (B, C, H, W), dtype=jnp.float32)

    kernel_size, stride = 3, 2
    out = jax.block_until_ready(blur_pool2d(x, kernel_size, stride))

    ref = _reference_blur_pool2d(x, kernel_size, stride)
    assert out.shape == ref.shape == (B, C, 8, 8)
    assert jnp.allclose(out, ref, atol=1e-5, rtol=1e-5), "mismatch vs reference conv"

    print("KERNEL_OK")
</pallas_src>

<mosaic_0001>
module attributes {stable_mosaic.version = 11 : i64} {
  func.func @_blurpool_kernel(%arg0: i32, %arg1: memref<18x18x8xf32, #tpu.memory_space<vmem>>, %arg2: memref<8x8x8xf32, #tpu.memory_space<vmem>>) attributes {dimension_semantics = [#tpu.dimension_semantics<parallel>], iteration_bounds = array<i64: 1>, scalar_prefetch = 0 : i64, scratch_operands = 0 : i64, tpu.core_type = #tpu.core_type<tc>, window_params = [{transform_indices = @transform_0, window_bounds = array<i64: 18, 18, 8>}, {transform_indices = @transform_1, window_bounds = array<i64: 8, 8, 8>}]} {
    %c0 = arith.constant 0 : index
    %c0_0 = arith.constant 0 : index
    %c0_1 = arith.constant 0 : index
    %0 = tpu.strided_load %arg1[%c0, %c0_0, %c0_1] {strides = array<i32: 1, 2, 1>} : memref<18x18x8xf32, #tpu.memory_space<vmem>>, vector<17x8x8xf32>
    %cst = arith.constant 2.500000e-01 : f32
    %1 = vector.broadcast %cst : f32 to vector<17x8x8xf32>
    %2 = arith.mulf %1, %0 : vector<17x8x8xf32>
    %c0_2 = arith.constant 0 : index
    %c1 = arith.constant 1 : index
    %c0_3 = arith.constant 0 : index
    %3 = tpu.strided_load %arg1[%c0_2, %c1, %c0_3] {strides = array<i32: 1, 2, 1>} : memref<18x18x8xf32, #tpu.memory_space<vmem>>, vector<17x8x8xf32>
    %cst_4 = arith.constant 5.000000e-01 : f32
    %4 = vector.broadcast %cst_4 : f32 to vector<17x8x8xf32>
    %5 = arith.mulf %4, %3 : vector<17x8x8xf32>
    %6 = arith.addf %2, %5 : vector<17x8x8xf32>
    %c0_5 = arith.constant 0 : index
    %c2 = arith.constant 2 : index
    %c0_6 = arith.constant 0 : index
    %7 = tpu.strided_load %arg1[%c0_5, %c2, %c0_6] {strides = array<i32: 1, 2, 1>} : memref<18x18x8xf32, #tpu.memory_space<vmem>>, vector<17x8x8xf32>
    %cst_7 = arith.constant 2.500000e-01 : f32
    %8 = vector.broadcast %cst_7 : f32 to vector<17x8x8xf32>
    %9 = arith.mulf %8, %7 : vector<17x8x8xf32>
    %10 = arith.addf %6, %9 : vector<17x8x8xf32>
    %11 = vector.extract_strided_slice %10 {offsets = [0, 0, 0], sizes = [1, 8, 8], strides = [1, 1, 1]} : vector<17x8x8xf32> to vector<1x8x8xf32>
    %12 = vector.shape_cast %11 : vector<1x8x8xf32> to vector<8x8xf32>
    %cst_8 = arith.constant 2.500000e-01 : f32
    %13 = vector.broadcast %cst_8 : f32 to vector<8x8xf32>
    %14 = arith.mulf %13, %12 : vector<8x8xf32>
    %15 = vector.extract_strided_slice %10 {offsets = [1, 0, 0], sizes = [1, 8, 8], strides = [1, 1, 1]} : vector<17x8x8xf32> to vector<1x8x8xf32>
    %16 = vector.shape_cast %15 : vector<1x8x8xf32> to vector<8x8xf32>
    %cst_9 = arith.constant 5.000000e-01 : f32
    %17 = vector.broadcast %cst_9 : f32 to vector<8x8xf32>
    %18 = arith.mulf %17, %16 : vector<8x8xf32>
    %19 = arith.addf %14, %18 : vector<8x8xf32>
    %20 = vector.extract_strided_slice %10 {offsets = [2, 0, 0], sizes = [1, 8, 8], strides = [1, 1, 1]} : vector<17x8x8xf32> to vector<1x8x8xf32>
    %21 = vector.shape_cast %20 : vector<1x8x8xf32> to vector<8x8xf32>
    %cst_10 = arith.constant 2.500000e-01 : f32
    %22 = vector.broadcast %cst_10 : f32 to vector<8x8xf32>
    %23 = arith.mulf %22, %21 : vector<8x8xf32>
    %24 = arith.addf %19, %23 : vector<8x8xf32>
    %c0_11 = arith.constant 0 : index
    %c0_12 = arith.constant 0 : index
    %c0_13 = arith.constant 0 : index
    %25 = vector.load %arg2[%c0_11, %c0_12, %c0_13] : memref<8x8x8xf32, #tpu.memory_space<vmem>>, vector<1x8x8xf32>
    %26 = vector.shape_cast %25 : vector<1x8x8xf32> to vector<8x8xf32>
    %27 = vector.shape_cast %24 : vector<8x8xf32> to vector<1x8x8xf32>
    tpu.vector_store %arg2[%c0_11, %c0_12, %c0_13], %27 {strides = array<i32>} : memref<8x8x8xf32, #tpu.memory_space<vmem>>, vector<1x8x8xf32>,
    %28 = vector.extract_strided_slice %10 {offsets = [2, 0, 0], sizes = [1, 8, 8], strides = [1, 1, 1]} : vector<17x8x8xf32> to vector<1x8x8xf32>
    %29 = vector.shape_cast %28 : vector<1x8x8xf32> to vector<8x8xf32>
    %cst_14 = arith.constant 2.500000e-01 : f32
    %30 = vector.broadcast %cst_14 : f32 to vector<8x8xf32>
    %31 = arith.mulf %30, %29 : vector<8x8xf32>
    %32 = vector.extract_strided_slice %10 {offsets = [3, 0, 0], sizes = [1, 8, 8], strides = [1, 1, 1]} : vector<17x8x8xf32> to vector<1x8x8xf32>
    %33 = vector.shape_cast %32 : vector<1x8x8xf32> to vector<8x8xf32>
    %cst_15 = arith.constant 5.000000e-01 : f32
    %34 = vector.broadcast %cst_15 : f32 to vector<8x8xf32>
    %35 = arith.mulf %34, %33 : vector<8x8xf32>
    %36 = arith.addf %31, %35 : vector<8x8xf32>
    %37 = vector.extract_strided_slice %10 {offsets = [4, 0, 0], sizes = [1, 8, 8], strides = [1, 1, 1]} : vector<17x8x8xf32> to vector<1x8x8xf32>
    %38 = vector.shape_cast %37 : vector<1x8x8xf32> to vector<8x8xf32>
    %cst_16 = arith.constant 2.500000e-01 : f32
    %39 = vector.broadcast %cst_16 : f32 to vector<8x8xf32>
    %40 = arith.mulf %39, %38 : vector<8x8xf32>
    %41 = arith.addf %36, %40 : vector<8x8xf32>
    %c1_17 = arith.constant 1 : index
    %c0_18 = arith.constant 0 : index
    %c0_19 = arith.constant 0 : index
    %42 = vector.load %arg2[%c1_17, %c0_18, %c0_19] : memref<8x8x8xf32, #tpu.memory_space<vmem>>, vector<1x8x8xf32>
    %43 = vector.shape_cast %42 : vector<1x8x8xf32> to vector<8x8xf32>
    %44 = vector.shape_cast %41 : vector<8x8xf32> to vector<1x8x8xf32>
    tpu.vector_store %arg2[%c1_17, %c0_18, %c0_19], %44 {strides = array<i32>} : memref<8x8x8xf32, #tpu.memory_space<vmem>>, vector<1x8x8xf32>,
    %45 = vector.extract_strided_slice %10 {offsets = [4, 0, 0], sizes = [1, 8, 8], strides = [1, 1, 1]} : vector<17x8x8xf32> to vector<1x8x8xf32>
    %46 = vector.shape_cast %45 : vector<1x8x8xf32> to vector<8x8xf32>
    %cst_20 = arith.constant 2.500000e-01 : f32
    %47 = vector.broadcast %cst_20 : f32 to vector<8x8xf32>
    %48 = arith.mulf %47, %46 : vector<8x8xf32>
    %49 = vector.extract_strided_slice %10 {offsets = [5, 0, 0], sizes = [1, 8, 8], strides = [1, 1, 1]} : vector<17x8x8xf32> to vector<1x8x8xf32>
    %50 = vector.shape_cast %49 : vector<1x8x8xf32> to vector<8x8xf32>
    %cst_21 = arith.constant 5.000000e-01 : f32
    %51 = vector.broadcast %cst_21 : f32 to vector<8x8xf32>
    %52 = arith.mulf %51, %50 : vector<8x8xf32>
    %53 = arith.addf %48, %52 : vector<8x8xf32>
    %54 = vector.extract_strided_slice %10 {offsets = [6, 0, 0], sizes = [1, 8, 8], strides = [1, 1, 1]} : vector<17x8x8xf32> to vector<1x8x8xf32>
    %55 = vector.shape_cast %54 : vector<1x8x8xf32> to vector<8x8xf32>
    %cst_22 = arith.constant 2.500000e-01 : f32
    %56 = vector.broadcast %cst_22 : f32 to vector<8x8xf32>
    %57 = arith.mulf %56, %55 : vector<8x8xf32>
    %58 = arith.addf %53, %57 : vector<8x8xf32>
    %c2_23 = arith.constant 2 : index
    %c0_24 = arith.constant 0 : index
    %c0_25 = arith.constant 0 : index
    %59 = vector.load %arg2[%c2_23, %c0_24, %c0_25] : memref<8x8x8xf32, #tpu.memory_space<vmem>>, vector<1x8x8xf32>
    %60 = vector.shape_cast %59 : vector<1x8x8xf32> to vector<8x8xf32>
    %61 = vector.shape_cast %58 : vector<8x8xf32> to vector<1x8x8xf32>
    tpu.vector_store %arg2[%c2_23, %c0_24, %c0_25], %61 {strides = array<i32>} : memref<8x8x8xf32, #tpu.memory_space<vmem>>, vector<1x8x8xf32>,
    %62 = vector.extract_strided_slice %10 {offsets = [6, 0, 0], sizes = [1, 8, 8], strides = [1, 1, 1]} : vector<17x8x8xf32> to vector<1x8x8xf32>
    %63 = vector.shape_cast %62 : vector<1x8x8xf32> to vector<8x8xf32>
    %cst_26 = arith.constant 2.500000e-01 : f32
    %64 = vector.broadcast %cst_26 : f32 to vector<8x8xf32>
    %65 = arith.mulf %64, %63 : vector<8x8xf32>
    %66 = vector.extract_strided_slice %10 {offsets = [7, 0, 0], sizes = [1, 8, 8], strides = [1, 1, 1]} : vector<17x8x8xf32> to vector<1x8x8xf32>
    %67 = vector.shape_cast %66 : vector<1x8x8xf32> to vector<8x8xf32>
    %cst_27 = arith.constant 5.000000e-01 : f32
    %68 = vector.broadcast %cst_27 : f32 to vector<8x8xf32>
    %69 = arith.mulf %68, %67 : vector<8x8xf32>
    %70 = arith.addf %65, %69 : vector<8x8xf32>
    %71 = vector.extract_strided_slice %10 {offsets = [8, 0, 0], sizes = [1, 8, 8], strides = [1, 1, 1]} : vector<17x8x8xf32> to vector<1x8x8xf32>
    %72 = vector.shape_cast %71 : vector<1x8x8xf32> to vector<8x8xf32>
    %cst_28 = arith.constant 2.500000e-01 : f32
    %73 = vector.broadcast %cst_28 : f32 to vector<8x8xf32>
    %74 = arith.mulf %73, %72 : vector<8x8xf32>
    %75 = arith.addf %70, %74 : vector<8x8xf32>
    %c3 = arith.constant 3 : index
    %c0_29 = arith.constant 0 : index
    %c0_30 = arith.constant 0 : index
    %76 = vector.load %arg2[%c3, %c0_29, %c0_30] : memref<8x8x8xf32, #tpu.memory_space<vmem>>, vector<1x8x8xf32>
    %77 = vector.shape_cast %76 : vector<1x8x8xf32> to vector<8x8xf32>
    %78 = vector.shape_cast %75 : vector<8x8xf32> to vector<1x8x8xf32>
    tpu.vector_store %arg2[%c3, %c0_29, %c0_30], %78 {strides = array<i32>} : memref<8x8x8xf32, #tpu.memory_space<vmem>>, vector<1x8x8xf32>,
    %79 = vector.extract_strided_slice %10 {offsets = [8, 0, 0], sizes = [1, 8, 8], strides = [1, 1, 1]} : vector<17x8x8xf32> to vector<1x8x8xf32>
    %80 = vector.shape_cast %79 : vector<1x8x8xf32> to vector<8x8xf32>
    %cst_31 = arith.constant 2.500000e-01 : f32
    %81 = vector.broadcast %cst_31 : f32 to vector<8x8xf32>
    %82 = arith.mulf %81, %80 : vector<8x8xf32>
    %83 = vector.extract_strided_slice %10 {offsets = [9, 0, 0], sizes = [1, 8, 8], strides = [1, 1, 1]} : vector<17x8x8xf32> to vector<1x8x8xf32>
    %84 = vector.shape_cast %83 : vector<1x8x8xf32> to vector<8x8xf32>
    %cst_32 = arith.constant 5.000000e-01 : f32
    %85 = vector.broadcast %cst_32 : f32 to vector<8x8xf32>
    %86 = arith.mulf %85, %84 : vector<8x8xf32>
    %87 = arith.addf %82, %86 : vector<8x8xf32>
    %88 = vector.extract_strided_slice %10 {offsets = [10, 0, 0], sizes = [1, 8, 8], strides = [1, 1, 1]} : vector<17x8x8xf32> to vector<1x8x8xf32>
    %89 = vector.shape_cast %88 : vector<1x8x8xf32> to vector<8x8xf32>
    %cst_33 = arith.constant 2.500000e-01 : f32
    %90 = vector.broadcast %cst_33 : f32 to vector<8x8xf32>
    %91 = arith.mulf %90, %89 : vector<8x8xf32>
    %92 = arith.addf %87, %91 : vector<8x8xf32>
    %c4 = arith.constant 4 : index
    %c0_34 = arith.constant 0 : index
    %c0_35 = arith.constant 0 : index
    %93 = vector.load %arg2[%c4, %c0_34, %c0_35] : memref<8x8x8xf32, #tpu.memory_space<vmem>>, vector<1x8x8xf32>
    %94 = vector.shape_cast %93 : vector<1x8x8xf32> to vector<8x8xf32>
    %95 = vector.shape_cast %92 : vector<8x8xf32> to vector<1x8x8xf32>
    tpu.vector_store %arg2[%c4, %c0_34, %c0_35], %95 {strides = array<i32>} : memref<8x8x8xf32, #tpu.memory_space<vmem>>, vector<1x8x8xf32>,
    %96 = vector.extract_strided_slice %10 {offsets = [10, 0, 0], sizes = [1, 8, 8], strides = [1, 1, 1]} : vector<17x8x8xf32> to vector<1x8x8xf32>
    %97 = vector.shape_cast %96 : vector<1x8x8xf32> to vector<8x8xf32>
    %cst_36 = arith.constant 2.500000e-01 : f32
    %98 = vector.broadcast %cst_36 : f32 to vector<8x8xf32>
    %99 = arith.mulf %98, %97 : vector<8x8xf32>
    %100 = vector.extract_strided_slice %10 {offsets = [11, 0, 0], sizes = [1, 8, 8], strides = [1, 1, 1]} : vector<17x8x8xf32> to vector<1x8x8xf32>
    %101 = vector.shape_cast %100 : vector<1x8x8xf32> to vector<8x8xf32>
    %cst_37 = arith.constant 5.000000e-01 : f32
    %102 = vector.broadcast %cst_37 : f32 to vector<8x8xf32>
    %103 = arith.mulf %102, %101 : vector<8x8xf32>
    %104 = arith.addf %99, %103 : vector<8x8xf32>
    %105 = vector.extract_strided_slice %10 {offsets = [12, 0, 0], sizes = [1, 8, 8], strides = [1, 1, 1]} : vector<17x8x8xf32> to vector<1x8x8xf32>
    %106 = vector.shape_cast %105 : vector<1x8x8xf32> to vector<8x8xf32>
    %cst_38 = arith.constant 2.500000e-01 : f32
    %107 = vector.broadcast %cst_38 : f32 to vector<8x8xf32>
    %108 = arith.mulf %107, %106 : vector<8x8xf32>
    %109 = arith.addf %104, %108 : vector<8x8xf32>
    %c5 = arith.constant 5 : index
    %c0_39 = arith.constant 0 : index
    %c0_40 = arith.constant 0 : index
    %110 = vector.load %arg2[%c5, %c0_39, %c0_40] : memref<8x8x8xf32, #tpu.memory_space<vmem>>, vector<1x8x8xf32>
    %111 = vector.shape_cast %110 : vector<1x8x8xf32> to vector<8x8xf32>
    %112 = vector.shape_cast %109 : vector<8x8xf32> to vector<1x8x8xf32>
    tpu.vector_store %arg2[%c5, %c0_39, %c0_40], %112 {strides = array<i32>} : memref<8x8x8xf32, #tpu.memory_space<vmem>>, vector<1x8x8xf32>,
    %113 = vector.extract_strided_slice %10 {offsets = [12, 0, 0], sizes = [1, 8, 8], strides = [1, 1, 1]} : vector<17x8x8xf32> to vector<1x8x8xf32>
    %114 = vector.shape_cast %113 : vector<1x8x8xf32> to vector<8x8xf32>
    %cst_41 = arith.constant 2.500000e-01 : f32
    %115 = vector.broadcast %cst_41 : f32 to vector<8x8xf32>
    %116 = arith.mulf %115, %114 : vector<8x8xf32>
    %117 = vector.extract_strided_slice %10 {offsets = [13, 0, 0], sizes = [1, 8, 8], strides = [1, 1, 1]} : vector<17x8x8xf32> to vector<1x8x8xf32>
    %118 = vector.shape_cast %117 : vector<1x8x8xf32> to vector<8x8xf32>
    %cst_42 = arith.constant 5.000000e-01 : f32
    %119 = vector.broadcast %cst_42 : f32 to vector<8x8xf32>
    %120 = arith.mulf %119, %118 : vector<8x8xf32>
    %121 = arith.addf %116, %120 : vector<8x8xf32>
    %122 = vector.extract_strided_slice %10 {offsets = [14, 0, 0], sizes = [1, 8, 8], strides = [1, 1, 1]} : vector<17x8x8xf32> to vector<1x8x8xf32>
    %123 = vector.shape_cast %122 : vector<1x8x8xf32> to vector<8x8xf32>
    %cst_43 = arith.constant 2.500000e-01 : f32
    %124 = vector.broadcast %cst_43 : f32 to vector<8x8xf32>
    %125 = arith.mulf %124, %123 : vector<8x8xf32>
    %126 = arith.addf %121, %125 : vector<8x8xf32>
    %c6 = arith.constant 6 : index
    %c0_44 = arith.constant 0 : index
    %c0_45 = arith.constant 0 : index
    %127 = vector.load %arg2[%c6, %c0_44, %c0_45] : memref<8x8x8xf32, #tpu.memory_space<vmem>>, vector<1x8x8xf32>
    %128 = vector.shape_cast %127 : vector<1x8x8xf32> to vector<8x8xf32>
    %129 = vector.shape_cast %126 : vector<8x8xf32> to vector<1x8x8xf32>
    tpu.vector_store %arg2[%c6, %c0_44, %c0_45], %129 {strides = array<i32>} : memref<8x8x8xf32, #tpu.memory_space<vmem>>, vector<1x8x8xf32>,
    %130 = vector.extract_strided_slice %10 {offsets = [14, 0, 0], sizes = [1, 8, 8], strides = [1, 1, 1]} : vector<17x8x8xf32> to vector<1x8x8xf32>
    %131 = vector.shape_cast %130 : vector<1x8x8xf32> to vector<8x8xf32>
    %cst_46 = arith.constant 2.500000e-01 : f32
    %132 = vector.broadcast %cst_46 : f32 to vector<8x8xf32>
    %133 = arith.mulf %132, %131 : vector<8x8xf32>
    %134 = vector.extract_strided_slice %10 {offsets = [15, 0, 0], sizes = [1, 8, 8], strides = [1, 1, 1]} : vector<17x8x8xf32> to vector<1x8x8xf32>
    %135 = vector.shape_cast %134 : vector<1x8x8xf32> to vector<8x8xf32>
    %cst_47 = arith.constant 5.000000e-01 : f32
    %136 = vector.broadcast %cst_47 : f32 to vector<8x8xf32>
    %137 = arith.mulf %136, %135 : vector<8x8xf32>
    %138 = arith.addf %133, %137 : vector<8x8xf32>
    %139 = vector.extract_strided_slice %10 {offsets = [16, 0, 0], sizes = [1, 8, 8], strides = [1, 1, 1]} : vector<17x8x8xf32> to vector<1x8x8xf32>
    %140 = vector.shape_cast %139 : vector<1x8x8xf32> to vector<8x8xf32>
    %cst_48 = arith.constant 2.500000e-01 : f32
    %141 = vector.broadcast %cst_48 : f32 to vector<8x8xf32>
    %142 = arith.mulf %141, %140 : vector<8x8xf32>
    %143 = arith.addf %138, %142 : vector<8x8xf32>
    %c7 = arith.constant 7 : index
    %c0_49 = arith.constant 0 : index
    %c0_50 = arith.constant 0 : index
    %144 = vector.load %arg2[%c7, %c0_49, %c0_50] : memref<8x8x8xf32, #tpu.memory_space<vmem>>, vector<1x8x8xf32>
    %145 = vector.shape_cast %144 : vector<1x8x8xf32> to vector<8x8xf32>
    %146 = vector.shape_cast %143 : vector<8x8xf32> to vector<1x8x8xf32>
    tpu.vector_store %arg2[%c7, %c0_49, %c0_50], %146 {strides = array<i32>} : memref<8x8x8xf32, #tpu.memory_space<vmem>>, vector<1x8x8xf32>,
    return
  }
  func.func @transform_0(%arg0: i32) -> (i32, i32, i32) {
    %c0_i32 = arith.constant 0 : i32
    %c0_i32_0 = arith.constant 0 : i32
    %c0_i32_1 = arith.constant 0 : i32
    return %c0_i32, %c0_i32_0, %arg0 : i32, i32, i32
  }
  func.func @transform_1(%arg0: i32) -> (i32, i32, i32) {
    %c0_i32 = arith.constant 0 : i32
    %c0_i32_0 = arith.constant 0 : i32
    %c0_i32_1 = arith.constant 0 : i32
    return %c0_i32, %c0_i32_0, %arg0 : i32, i32, i32
  }
}

</mosaic_0001>

<bundles_post_ra>
// kernel: tpu_custom_call.1
= control target key start
LH: loop header
LB: loop body
LE: loop exit
PB: predicated region body
PF: predicated region fallthrough
CT: control target
= control target key end

     0   :  { %vm200_vm0 = vcmask 64512   ;;  %s523_s0 = inlined_call_operand.vmem [shape: f32[18,18,8], index: 0, kind: input, shape index: {}]   ;;  %s524_s1 = inlined_call_operand.hbm [shape: f32[8,8,8], index: 1, kind: output, shape index: {}]  }
   0x1   :  { %v9_v0 = vld [vmem:[%s523_s0] ss:$2 sm:$0xff]  ;;  %v261_v2 = vld [vmem:[%s523_s0 + $0x30] ss:$2 sm:$0xff]  ;;  %v276_v6 = vld [vmem:[%s523_s0 + $0x1] ss:$2 sm:$0xff] }
   0x2   :  { %v260_v1 = vld [vmem:[%s523_s0 + $0x18] ss:$2 sm:$0xff]  ;;  %v42_v3 = vmul.f32 0.25, %v9_v0  ;;  %v44_v5 = vmul.f32 0.25, %v261_v2  ;;  %v277_v7 = vld [vmem:[%s523_s0 + $0x19] ss:$2 sm:$0xff] }
   0x3   :  { %v43_v4 = vmul.f32 0.25, %v260_v1  ;;  %v278_v8 = vld [vmem:[%s523_s0 + $0x31] ss:$2 sm:$0xff]  ;;  %v93_v9 = vmul.f32 0.5, %v276_v6  ;;  %v94_v10 = vmul.f32 0.5, %v277_v7 }
   0x4   :  { %v95_v11 = vmul.f32 0.5, %v278_v8  ;;  %v293_v12 = vld [vmem:[%s523_s0 + $0x2] ss:$2 sm:$0xff]  ;;  %v295_v15 = vld [vmem:[%s523_s0 + $0x32] ss:$2 sm:$0xff] }
   0x5   :  { %v294_v13 = vld [vmem:[%s523_s0 + $0x1a] ss:$2 sm:$0xff]  ;;  %v110_v14 = vadd.f32 %v93_v9, %v42_v3  ;;  %v161_v16 = vmul.f32 0.25, %v293_v12  ;;  %v111_v19 = vadd.f32 %v94_v10, %v43_v4  ;;  %v163_v21 = vmul.f32 0.25, %v295_v15  ;;  %v279_v24 = vld [vmem:[%s523_s0 + $0x49] ss:$2 sm:$0xff] }
   0x6   :  { %v162_v17 = vmul.f32 0.25, %v294_v13  ;;  %v262_v18 = vld [vmem:[%s523_s0 + $0x48] ss:$2 sm:$0xff]  ;;  %v112_v20 = vadd.f32 %v95_v11, %v44_v5  ;;  %v280_v27 = vld [vmem:[%s523_s0 + $0x61] ss:$2 sm:$0xff]  ;;  %v96_v28 = vmul.f32 0.5, %v279_v24 }
   0x7   :  { %v263_v22 = vld [vmem:[%s523_s0 + $0x60] ss:$2 sm:$0xff]  ;;  %v45_v23 = vmul.f32 0.25, %v262_v18  ;;  %v178_v25 = vadd.f32 %v161_v16, %v110_v14  ;;  %v97_v32 = vmul.f32 0.5, %v280_v27  ;;  %v265_v39 = vld [vmem:[%s523_s0 + $0x90] ss:$2 sm:$0xff] }
   0x8   :  { %v46_v26 = vmul.f32 0.25, %v263_v22  ;;  %v296_v29 = vld [vmem:[%s523_s0 + $0x4a] ss:$2 sm:$0xff]  ;;  %v179_v30 = vadd.f32 %v162_v17, %v111_v19  ;;  %v180_v31 = vadd.f32 %v163_v21, %v112_v20  ;;  %v48_v43 = vmul.f32 0.25, %v265_v39  ;;  %v281_v44 = vld [vmem:[%s523_s0 + $0x79] ss:$2 sm:$0xff] }
   0x9   :  { %v297_v33 = vld [vmem:[%s523_s0 + $0x62] ss:$2 sm:$0xff]  ;;  %v164_v34 = vmul.f32 0.25, %v296_v29  ;;  %v195_v36 = vmul.f32 0.25, %v178_v25  ;;  %v113_v37 = vadd.f32 %v96_v28, %v45_v23  ;;  %v282_v47 = vld [vmem:[%s523_s0 + $0x91] ss:$2 sm:$0xff] }
   0xa   :  { %v264_v35 = vld [vmem:[%s523_s0 + $0x78] ss:$2 sm:$0xff]  ;;  %v165_v38 = vmul.f32 0.25, %v297_v33  ;;  %v196_v41 = vmul.f32 0.5, %v179_v30  ;;  %v114_v42 = vadd.f32 %v97_v32, %v46_v26  ;;  %v198_v45 = vmul.f32 0.25, %v180_v31 }
   0xb   :  { %v47_v40 = vmul.f32 0.25, %v264_v35  ;;  %v181_v46 = vadd.f32 %v164_v34, %v113_v37  ;;  %v98_v48 = vmul.f32 0.5, %v281_v44  ;;  %v298_v49 = vld [vmem:[%s523_s0 + $0x7a] ss:$2 sm:$0xff]  ;;  %v99_v52 = vmul.f32 0.5, %v282_v47 }
   0xc   :  { %v197_v50 = vadd.f32 %v196_v41, %v195_v36  ;;  %v182_v51 = vadd.f32 %v165_v38, %v114_v42  ;;  %v299_v53 = vld [vmem:[%s523_s0 + $0x92] ss:$2 sm:$0xff]  ;;  %v166_v54 = vmul.f32 0.25, %v298_v49  ;;  %v283_v1 = vld [vmem:[%s523_s0 + $0xa9] ss:$2 sm:$0xff] }
   0xd   :  { %v266_v55 = vld [vmem:[%s523_s0 + $0xa8] ss:$2 sm:$0xff]  ;;  %v202_v56 = vmul.f32 0.5, %v181_v46  ;;  %v115_v57 = vadd.f32 %v98_v48, %v47_v40  ;;  %v167_v58 = vmul.f32 0.25, %v299_v53  ;;  %v116_v63 = vadd.f32 %v99_v52, %v48_v43  ;;  %v284_v2 = vld [vmem:[%s523_s0 + $0xc1] ss:$2 sm:$0xff] }
   0xe   :  { %v267_v59 = vld [vmem:[%s523_s0 + $0xc0] ss:$2 sm:$0xff]  ;;  %v49_v60 = vmul.f32 0.25, %v266_v55  ;;  %v199_v61 = vadd.f32 %v198_v45, %v197_v50  ;;  %v204_v62 = vmul.f32 0.25, %v182_v51  ;;  %v100_v5 = vmul.f32 0.5, %v283_v1 }
   0xf   :  { %v50_v0 = vmul.f32 0.25, %v267_v59  ;;  %v203_v3 = vadd.f32 %v202_v56, %v198_v45  ;;  %v183_v4 = vadd.f32 %v166_v54, %v115_v57  ;;  %v101_v6 = vmul.f32 0.5, %v284_v2  ;;  %v300_v7 = vld [vmem:[%s523_s0 + $0xaa] ss:$2 sm:$0xff]  ;;  %v285_v18 = vld [vmem:[%s523_s0 + $0xd9] ss:$2 sm:$0xff] }
  0x10   :  { %v301_v8 = vld [vmem:[%s523_s0 + $0xc2] ss:$2 sm:$0xff]  ;;  %201 = vst.msk [vmem:[#allocation2] sm:$0xff] %vm200_vm0, %v199_v61  ;;  %v184_v9 = vadd.f32 %v167_v58, %v116_v63  ;;  %v168_v10 = vmul.f32 0.25, %v300_v7  ;;  %v117_v16 = vadd.f32 %v100_v5, %v49_v60  ;;  %v286_v19 = vld [vmem:[%s523_s0 + $0xf1] ss:$2 sm:$0xff] }
  0x11   :  { %v169_v11 = vmul.f32 0.25, %v301_v8  ;;  %v268_v12 = vld [vmem:[%s523_s0 + $0xd8] ss:$2 sm:$0xff]  ;;  %v205_v14 = vadd.f32 %v204_v62, %v203_v3  ;;  %v208_v15 = vmul.f32 0.5, %v183_v4  ;;  %v118_v17 = vadd.f32 %v101_v6, %v50_v0  ;;  %v270_v30 = vld [vmem:[%s523_s0 + $0x108] ss:$2 sm:$0xff] }
  0x12   :  { %v269_v13 = vld [vmem:[%s523_s0 + $0xf0] ss:$2 sm:$0xff]  ;;  %v210_v20 = vmul.f32 0.25, %v184_v9  ;;  %v51_v21 = vmul.f32 0.25, %v268_v12  ;;  %v102_v23 = vmul.f32 0.5, %v285_v18  ;;  %v185_v26 = vadd.f32 %v168_v10, %v117_v16 }
  0x13   :  { %v52_v22 = vmul.f32 0.25, %v269_v13  ;;  %v302_v24 = vld [vmem:[%s523_s0 + $0xda] ss:$2 sm:$0xff]  ;;  %207 = vst.msk [vmem:[#allocation2 + $0x8] sm:$0xff] %vm200_vm0, %v205_v14  ;;  %v209_v25 = vadd.f32 %v208_v15, %v204_v62  ;;  %v186_v27 = vadd.f32 %v169_v11, %v118_v17  ;;  %v103_v28 = vmul.f32 0.5, %v286_v19 }
  0x14   :  { %v303_v29 = vld [vmem:[%s523_s0 + $0xf2] ss:$2 sm:$0xff]  ;;  %v119_v31 = vadd.f32 %v102_v23, %v51_v21  ;;  %v170_v32 = vmul.f32 0.25, %v302_v24  ;;  %v53_v35 = vmul.f32 0.25, %v270_v30  ;;  %v214_v37 = vmul.f32 0.5, %v185_v26 }
  0x15   :  { %v171_v33 = vmul.f32 0.25, %v303_v29  ;;  %v271_v34 = vld [vmem:[%s523_s0 + $0x120] ss:$2 sm:$0xff]  ;;  %v211_v36 = vadd.f32 %v210_v20, %v209_v25  ;;  %v216_v38 = vmul.f32 0.25, %v186_v27  ;;  %v120_v39 = vadd.f32 %v103_v28, %v52_v22  ;;  %v287_v40 = vld [vmem:[%s523_s0 + $0x109] ss:$2 sm:$0xff] }
  0x16   :  { %v288_v41 = vld [vmem:[%s523_s0 + $0x121] ss:$2 sm:$0xff]  ;;  %v187_v42 = vadd.f32 %v170_v32, %v119_v31  ;;  %v54_v43 = vmul.f32 0.25, %v271_v34  ;;  %v104_v44 = vmul.f32 0.5, %v287_v40  ;;  %v304_v46 = vld [vmem:[%s523_s0 + $0x10a] ss:$2 sm:$0xff]  ;;  %v215_v47 = vadd.f32 %v214_v37, %v210_v20 }
  0x17   :  { %v105_v45 = vmul.f32 0.5, %v288_v41  ;;  %213 = vst.msk [vmem:[#allocation2 + $0x10] sm:$0xff] %vm200_vm0, %v211_v36  ;;  %v188_v48 = vadd.f32 %v171_v33, %v120_v39  ;;  %v305_v49 = vld [vmem:[%s523_s0 + $0x122] ss:$2 sm:$0xff]  ;;  %v172_v50 = vmul.f32 0.25, %v304_v46 }
  0x18   :  { %v272_v51 = vld [vmem:[%s523_s0 + $0x138] ss:$2 sm:$0xff]  ;;  %v220_v52 = vmul.f32 0.5, %v187_v42  ;;  %v121_v53 = vadd.f32 %v104_v44, %v53_v35  ;;  %v173_v55 = vmul.f32 0.25, %v305_v49  ;;  %v289_v57 = vld [vmem:[%s523_s0 + $0x139] ss:$2 sm:$0xff]  ;;  %v217_v58 = vadd.f32 %v216_v38, %v215_v47 }
  0x19   :  { %v122_v54 = vadd.f32 %v105_v45, %v54_v43  ;;  %v273_v56 = vld [vmem:[%s523_s0 + $0x150] ss:$2 sm:$0xff]  ;;  %v222_v59 = vmul.f32 0.25, %v188_v48  ;;  %v55_v60 = vmul.f32 0.25, %v272_v51  ;;  %v290_v62 = vld [vmem:[%s523_s0 + $0x151] ss:$2 sm:$0xff] }
  0x1a   :  { %v56_v61 = vmul.f32 0.25, %v273_v56  ;;  %v221_v63 = vadd.f32 %v220_v52, %v216_v38  ;;  %v189_v0 = vadd.f32 %v172_v50, %v121_v53  ;;  %v106_v2 = vmul.f32 0.5, %v289_v57  ;;  %v306_v3 = vld [vmem:[%s523_s0 + $0x13a] ss:$2 sm:$0xff]  ;;  %219 = vst.msk [vmem:[#allocation2 + $0x18] sm:$0xff] %vm200_vm0, %v217_v58 }
  0x1b   :  { %v190_v1 = vadd.f32 %v173_v55, %v122_v54  ;;  %v307_v4 = vld [vmem:[%s523_s0 + $0x152] ss:$2 sm:$0xff]  ;;  %v107_v5 = vmul.f32 0.5, %v290_v62  ;;  %v174_v6 = vmul.f32 0.25, %v306_v3  ;;  %v291_v13 = vld [vmem:[%s523_s0 + $0x169] ss:$2 sm:$0xff] }
  0x1c   :  { %v175_v7 = vmul.f32 0.25, %v307_v4  ;;  %v274_v8 = vld [vmem:[%s523_s0 + $0x168] ss:$2 sm:$0xff]  ;;  %v223_v9 = vadd.f32 %v222_v59, %v221_v63  ;;  %v226_v10 = vmul.f32 0.5, %v189_v0  ;;  %v123_v11 = vadd.f32 %v106_v2, %v55_v60  ;;  %v292_v17 = vld [vmem:[%s523_s0 + $0x181] ss:$2 sm:$0xff] }
  0x1d   :  { %v275_v12 = vld [vmem:[%s523_s0 + $0x180] ss:$2 sm:$0xff]  ;;  %v124_v14 = vadd.f32 %v107_v5, %v56_v61  ;;  %v57_v15 = vmul.f32 0.25, %v274_v8  ;;  %v108_v18 = vmul.f32 0.5, %v291_v13  ;;  %v228_v20 = vmul.f32 0.25, %v190_v1 }
  0x1e   :  { %v58_v16 = vmul.f32 0.25, %v275_v12  ;;  %225 = vst.msk [vmem:[#allocation2 + $0x20] sm:$0xff] %vm200_vm0, %v223_v9  ;;  %v227_v19 = vadd.f32 %v226_v10, %v222_v59  ;;  %v191_v21 = vadd.f32 %v174_v6, %v123_v11  ;;  %v109_v22 = vmul.f32 0.5, %v292_v17  ;;  %v308_v23 = vld [vmem:[%s523_s0 + $0x16a] ss:$2 sm:$0xff] }
  0x1f   :  { %v309_v24 = vld [vmem:[%s523_s0 + $0x182] ss:$2 sm:$0xff]  ;;  %v192_v25 = vadd.f32 %v175_v7, %v124_v14  ;;  %v125_v26 = vadd.f32 %v108_v18, %v57_v15  ;;  %v176_v27 = vmul.f32 0.25, %v308_v23 }
  0x20   :  { %v177_v28 = vmul.f32 0.25, %v309_v24 }
  0x21   :  { %6 = vsyncpa [#allocation3], 0  ;;  %v229_v29 = vadd.f32 %v228_v20, %v227_v19  ;;  %v232_v30 = vmul.f32 0.5, %v191_v21  ;;  %v126_v31 = vadd.f32 %v109_v22, %v58_v16  ;;  %v234_v32 = vmul.f32 0.25, %v192_v25  ;;  %s337_s21 = smov [#allocation2]  }
  0x22   :  { %v193_v33 = vadd.f32 %v176_v27, %v125_v26  ;;  %s249_s22 = sshll.u32 %s337_s21, 4  ;;  %s250_s22 = int_to_ptr.vmem [resolvable:$true] %s249_s22 }
  0x23   :  { %231 = vst.msk [vmem:[#allocation2 + $0x28] sm:$0xff] %vm200_vm0, %v229_v29  ;;  %v233_v34 = vadd.f32 %v232_v30, %v228_v20  ;;  %v194_v35 = vadd.f32 %v177_v28, %v126_v31  ;;  %s313_s0 = scalar_lea.vmem %s250_s22, 1024  ;;  %p318_p1 = scmp.lt.s32.totalorder %s250_s22, %s250_s22 }
  0x24   :  { %v238_v36 = vmul.f32 0.5, %v193_v33  ;;  %p314_p0 = scmp.ne.s32.totalorder %s250_s22, %s313_s0  ;;  %p319_p2 = scmp.lt.s32.totalorder %s313_s0, %s313_s0 }
  0x25   :  { %v235_v37 = vadd.f32 %v234_v32, %v233_v34  ;;  %v240_v38 = vmul.f32 0.25, %v194_v35 }
  0x26   :  { %v239_v39 = vadd.f32 %v238_v36, %v234_v32  ;;  %p320_p3 = por %p319_p2, %p318_p1 }
  0x27   :  { %237 = vst.msk [vmem:[#allocation2 + $0x30] sm:$0xff] %vm200_vm0, %v235_v37 }
  0x28   :  { %v241_v40 = vadd.f32 %v240_v38, %v239_v39  ;;  %p321_p4 = pnand %p320_p3, %p314_p0 }
  0x2a   :  { %243 = vst.msk [vmem:[#allocation2 + $0x38] sm:$0xff] %vm200_vm0, %v241_v40 }
  0x2b   :  { %324 = shalt.err (!%p321_p4)
}
  0x2c   :  { %s325_s25 = scalar_lea.hbm %s524_s1, 1024 }
  0x2d   :  { %p326_p5 = scmp.ne.s32.totalorder %s524_s1, %s325_s25  ;;  %p329_p6 = scmp.lt.u32.totalorder %s325_s25, %s524_s1 }
  0x2f   :  { %p331_p7 = pnand %p329_p6, %p326_p5 }
  0x31   :  { %334 = shalt.err (!%p331_p7)
}
  0x32   :  { %s338_s30 = smov 128   ;;  %s339_s2 = smov 8  }
  0x33   :  { %255 = dma.vmem_to_hbm [thread:$0]  %s250_s22, 1024, %s524_s1, [#allocation3], %s338_s30, %s338_s30, %s339_s2  }
  0x34   :  { %335 = dma.done.wait [#allocation3], 1024  }
  0x35   :  { %336 = vsyncadd [#allocation3], 4294966272 }
  0x36   :  { %259 = vsyncpa [#allocation3], 1 }

</bundles_post_ra>
